<compile_context>
chip_gen: v6e
topology: v6e:2x2x1
jax: 0.10.0
libtpu: 0.0.40
codegen_flags: <defaults>
</compile_context>

<pallas_src>
import jax
import jax.numpy as jnp
import numpy as np
from jax.experimental import pallas as pl
from jax.experimental.pallas import tpu as pltpu


def _make_kernel(emit_loss_map):
    def kernel(pred_ref, gt_ref, mask_ref,
               neg_val_ref, mult_ref, pos_cnt_ref, neg_cnt_ref, pos_sum_ref,
               *rest):
        pred = pred_ref[...]            # (N, S, 128)
        gt = gt_ref[...]                # (N, S, 128)
        mask = mask_ref[...]            # (N, S, 128)

        # torch.nn.functional.binary_cross_entropy(..., reduction='none')
        # clamps log() at -100.
        log_p = jnp.maximum(jnp.log(pred), -100.0)
        log_1mp = jnp.maximum(jnp.log(1.0 - pred), -100.0)
        loss = -(gt * log_p + (1.0 - gt) * log_1mp)           # (N, S, 128)

        # .byte() truncation; assumes gt, mask in [0, 1] (DBNet convention),
        # so floor(gt*mask) == floor(gt)*floor(mask).
        gt_bin = jnp.floor(gt)                                # [gt == 1]
        neg_bin = jnp.floor(1.0 - gt)                         # [gt == 0]
        mask_bin = jnp.floor(mask)                            # [mask == 1]

        # Per-pixel mask multiplicity M[p] = sum_j [mask[j,p]==1]
        # (cheap vreg adds over the leading batch dim, no cross-lane reduce).
        m_cnt = jnp.sum(mask_bin, axis=0, keepdims=True)      # (1, S, 128)

        neg_val_ref[...] = loss * neg_bin                     # value of negative pixel
        mult_ref[...] = neg_bin * m_cnt                       # its multiplicity over j

        # Per-pixel partial reductions; the tiny final reduce happens in glue.
        pos_cnt_ref[...] = jnp.sum(gt_bin, axis=0) * m_cnt[0]
        neg_cnt_ref[...] = jnp.sum(neg_bin, axis=0) * m_cnt[0]
        pos_sum_ref[...] = jnp.sum(loss * gt_bin, axis=0) * m_cnt[0]

        if emit_loss_map:
            rest[0][...] = loss
    return kernel


def _vmem_caps():
    """(per-step tile budget, scoped vmem limit) in bytes, per TPU generation."""
    try:
        physical = int(pltpu.get_tpu_info().vmem_capacity_bytes)
    except Exception:                     # conservative (v7x-sized) fallback
        physical = 64 * 1024 * 1024
    budget = min(max(physical // 4, 8 << 20), 32 << 20)
    limit = min(physical // 2, 64 << 20)
    return budget, limit


def _pick_tiling(hw, n, emit_loss_map, budget_bytes):
    """Rows-of-128 per chunk (multiple of 8), chunk count, padded row count."""
    r0 = -(-hw // 128)                              # rows of 128 lanes
    n_big = n * (5 + (1 if emit_loss_map else 0))   # (N,S,128) blocks per step
    per_row = 2 * 4 * 128 * (n_big + 3)             # f32, double-buffered
    s_cap = max(8, min((budget_bytes // per_row) // 8 * 8, 1024))
    if r0 <= s_cap:
        num_chunks = 2 if r0 >= 16 else 1           # keep both v7x TCs busy
    else:
        num_chunks = -(-r0 // s_cap)
    rows = -(-r0 // num_chunks)
    s = -(-rows // 8) * 8
    return s, num_chunks, s * num_chunks


def balance_cross_entropy_loss(pred, gt, mask, negative_ratio=3.0, eps=1e-6,
                               return_origin=False):
    """pred, gt: (N, 1, H, W); mask: (N, H, W).  Returns a scalar."""
    N, C, H, W = pred.shape
    assert C == 1 and gt.shape == pred.shape and mask.shape == (N, H, W)
    HW = H * W

    budget, vmem_limit = _vmem_caps()
    S, num_chunks, R_pad = _pick_tiling(HW, N, return_origin, budget)
    HW_pad = R_pad * 128

    pred2 = pred.reshape(N, HW).astype(jnp.float32)
    gt2 = gt.reshape(N, HW).astype(jnp.float32)
    mask2 = mask.reshape(N, HW).astype(jnp.float32)
    pad = HW_pad - HW
    if pad:
        # pad: pred=0.5 (finite logs), gt=0, mask=0 -> M=0 -> zero contribution
        pred2 = jnp.pad(pred2, ((0, 0), (0, pad)), constant_values=0.5)
        gt2 = jnp.pad(gt2, ((0, 0), (0, pad)))
        mask2 = jnp.pad(mask2, ((0, 0), (0, pad)))
    pred3 = pred2.reshape(N, R_pad, 128)
    gt3 = gt2.reshape(N, R_pad, 128)
    mask3 = mask2.reshape(N, R_pad, 128)

    big = pl.BlockSpec((N, S, 128), lambda c: (0, c, 0))
    small = pl.BlockSpec((S, 128), lambda c: (c, 0))

    out_shape = [
        jax.ShapeDtypeStruct((N, R_pad, 128), jnp.float32),   # negative value
        jax.ShapeDtypeStruct((N, R_pad, 128), jnp.float32),   # negative multiplicity
        jax.ShapeDtypeStruct((R_pad, 128), jnp.float32),      # positive-count partial
        jax.ShapeDtypeStruct((R_pad, 128), jnp.float32),      # negative-count partial
        jax.ShapeDtypeStruct((R_pad, 128), jnp.float32),      # positive-loss partial
    ]
    out_specs = [big, big, small, small, small]
    if return_origin:
        out_shape.append(jax.ShapeDtypeStruct((N, R_pad, 128), jnp.float32))
        out_specs.append(big)

    outs = pl.pallas_call(
        _make_kernel(return_origin),
        out_shape=tuple(out_shape),
        grid_spec=pltpu.PrefetchScalarGridSpec(
            num_scalar_prefetch=0,
            grid=(num_chunks,),
            in_specs=[big, big, big],
            out_specs=tuple(out_specs),
        ),
        compiler_params=pltpu.CompilerParams(
            dimension_semantics=("parallel",),
            vmem_limit_bytes=vmem_limit),
    )(pred3, gt3, mask3)

    neg_val, mult, pos_cnt_pix, neg_cnt_pix, pos_sum_pix = outs[:5]

    # Exact integer count reductions (per-pixel values <= N^2 are f32-exact).
    positive_count = jnp.sum(pos_cnt_pix.astype(jnp.int32))
    negative_total = jnp.sum(neg_cnt_pix.astype(jnp.int32))
    cap = jnp.floor(positive_count.astype(jnp.float32) * negative_ratio)
    negative_count = jnp.minimum(negative_total, cap.astype(jnp.int32))

    pos_sum_total = jnp.sum(pos_sum_pix)

    # Exact multiplicity-weighted top-k over N*HW values; entries with m==0
    # (including padded pixels) are transparent to the selection.
    # TODO(synk): replace the sort with a two-pass threshold select (count /
    # sum above a binary-searched threshold), optionally in-kernel, for very
    # large images.
    v = neg_val.reshape(-1)
    m = mult.reshape(-1).astype(jnp.int32)
    v_s, m_s = jax.lax.sort((v, m), num_keys=1)        # ascending by value
    v_s, m_s = v_s[::-1], m_s[::-1]                    # descending
    cum = jnp.cumsum(m_s)
    take = jnp.clip(negative_count - (cum - m_s), 0, m_s)
    topk_sum = jnp.sum(v_s * take.astype(jnp.float32))

    denom = (positive_count + negative_count).astype(jnp.float32) + eps
    balance_loss = (pos_sum_total + topk_sum) / denom

    if return_origin:
        loss_map = outs[5].reshape(N, HW_pad)[:, :HW].reshape(N, 1, H, W)
        return balance_loss, loss_map
    return balance_loss


def _reference(pred, gt, mask, negative_ratio=3.0, eps=1e-6):
    """Pure-numpy replica of the PyTorch forward (including its broadcasting)."""
    pred = np.asarray(pred, np.float64)
    gt = np.asarray(gt, np.float64)
    mask = np.asarray(mask, np.float64)
    positive = (gt * mask).astype(np.uint8).astype(np.float64)          # (N,N,H,W)
    negative = ((1.0 - gt) * mask).astype(np.uint8).astype(np.float64)  # (N,N,H,W)
    positive_count = int(positive.sum())
    negative_count = min(int(negative.sum()), int(positive_count * negative_ratio))
    loss = -(gt * np.clip(np.log(pred), -100.0, None)
             + (1.0 - gt) * np.clip(np.log(1.0 - pred), -100.0, None))  # (N,1,H,W)
    positive_loss = loss * positive
    negative_loss = (loss * negative).reshape(-1)
    neg_topk = np.sort(negative_loss)[::-1][:negative_count]
    return (positive_loss.sum() + neg_topk.sum()) / (positive_count + negative_count + eps)


if __name__ == "__main__":
    key = jax.random.PRNGKey(0)
    k1, k2, k3 = jax.random.split(key, 3)
    N, C, H, W = 2, 1, 16, 16

    pred = jax.nn.sigmoid(jax.random.normal(k1, (N, C, H, W), jnp.float32))
    gt = (jax.random.uniform(k2, (N, C, H, W)) > 0.7).astype(jnp.float32)
    mask = (jax.random.uniform(k3, (N, H, W)) > 0.2).astype(jnp.float32)

    out = balance_cross_entropy_loss(pred, gt, mask)
    out = jax.block_until_ready(out)

    ref = _reference(pred, gt, mask)
    assert abs(float(out) - float(ref)) <= 2e-3 * max(1.0, abs(float(ref))), \
        (float(out), float(ref))
    print("KERNEL_OK")
</pallas_src>

<mosaic_0001>
module attributes {stable_mosaic.version = 11 : i64} {
  func.func @kernel(%arg0: i32, %arg1: memref<2x8x128xf32, #tpu.memory_space<vmem>>, %arg2: memref<2x8x128xf32, #tpu.memory_space<vmem>>, %arg3: memref<2x8x128xf32, #tpu.memory_space<vmem>>, %arg4: memref<2x8x128xf32, #tpu.memory_space<vmem>>, %arg5: memref<2x8x128xf32, #tpu.memory_space<vmem>>, %arg6: memref<8x128xf32, #tpu.memory_space<vmem>>, %arg7: memref<8x128xf32, #tpu.memory_space<vmem>>, %arg8: memref<8x128xf32, #tpu.memory_space<vmem>>) attributes {dimension_semantics = [#tpu.dimension_semantics<parallel>], iteration_bounds = array<i64: 1>, scalar_prefetch = 0 : i64, scratch_operands = 0 : i64, tpu.core_type = #tpu.core_type<tc>, window_params = [{transform_indices = @transform_0, window_bounds = array<i64: 2, 8, 128>}, {transform_indices = @transform_1, window_bounds = array<i64: 2, 8, 128>}, {transform_indices = @transform_2, window_bounds = array<i64: 2, 8, 128>}, {transform_indices = @transform_3, window_bounds = array<i64: 2, 8, 128>}, {transform_indices = @transform_4, window_bounds = array<i64: 2, 8, 128>}, {transform_indices = @transform_5, window_bounds = array<i64: 8, 128>}, {transform_indices = @transform_6, window_bounds = array<i64: 8, 128>}, {transform_indices = @transform_7, window_bounds = array<i64: 8, 128>}]} {
    %c0 = arith.constant 0 : index
    %c0_0 = arith.constant 0 : index
    %c0_1 = arith.constant 0 : index
    %0 = vector.load %arg1[%c0, %c0_0, %c0_1] : memref<2x8x128xf32, #tpu.memory_space<vmem>>, vector<2x8x128xf32>
    %c0_2 = arith.constant 0 : index
    %c0_3 = arith.constant 0 : index
    %c0_4 = arith.constant 0 : index
    %1 = vector.load %arg2[%c0_2, %c0_3, %c0_4] : memref<2x8x128xf32, #tpu.memory_space<vmem>>, vector<2x8x128xf32>
    %c0_5 = arith.constant 0 : index
    %c0_6 = arith.constant 0 : index
    %c0_7 = arith.constant 0 : index
    %2 = vector.load %arg3[%c0_5, %c0_6, %c0_7] : memref<2x8x128xf32, #tpu.memory_space<vmem>>, vector<2x8x128xf32>
    %3 = math.log %0 : vector<2x8x128xf32>
    %cst = arith.constant -1.000000e+02 : f32
    %4 = vector.broadcast %cst : f32 to vector<2x8x128xf32>
    %5 = arith.maximumf %3, %4 : vector<2x8x128xf32>
    %cst_8 = arith.constant 1.000000e+00 : f32
    %6 = vector.broadcast %cst_8 : f32 to vector<2x8x128xf32>
    %7 = arith.subf %6, %0 : vector<2x8x128xf32>
    %8 = math.log %7 : vector<2x8x128xf32>
    %cst_9 = arith.constant -1.000000e+02 : f32
    %9 = vector.broadcast %cst_9 : f32 to vector<2x8x128xf32>
    %10 = arith.maximumf %8, %9 : vector<2x8x128xf32>
    %11 = arith.mulf %1, %5 : vector<2x8x128xf32>
    %cst_10 = arith.constant 1.000000e+00 : f32
    %12 = vector.broadcast %cst_10 : f32 to vector<2x8x128xf32>
    %13 = arith.subf %12, %1 : vector<2x8x128xf32>
    %14 = arith.mulf %13, %10 : vector<2x8x128xf32>
    %15 = arith.addf %11, %14 : vector<2x8x128xf32>
    %cst_11 = arith.constant 0.000000e+00 : f32
    %16 = vector.broadcast %cst_11 : f32 to vector<2x8x128xf32>
    %17 = arith.subf %16, %15 : vector<2x8x128xf32>
    %18 = math.floor %1 : vector<2x8x128xf32>
    %cst_12 = arith.constant 1.000000e+00 : f32
    %19 = vector.broadcast %cst_12 : f32 to vector<2x8x128xf32>
    %20 = arith.subf %19, %1 : vector<2x8x128xf32>
    %21 = math.floor %20 : vector<2x8x128xf32>
    %22 = math.floor %2 : vector<2x8x128xf32>
    %cst_13 = arith.constant dense<0.000000e+00> : vector<8x128xf32>
    %23 = vector.multi_reduction <add>, %22, %cst_13 [0] : vector<2x8x128xf32> to vector<8x128xf32>
    %24 = vector.shape_cast %23 : vector<8x128xf32> to vector<1x8x128xf32>
    %25 = arith.mulf %17, %21 : vector<2x8x128xf32>
    %c0_14 = arith.constant 0 : index
    %c0_15 = arith.constant 0 : index
    %c0_16 = arith.constant 0 : index
    %26 = vector.load %arg4[%c0_14, %c0_15, %c0_16] : memref<2x8x128xf32, #tpu.memory_space<vmem>>, vector<2x8x128xf32>
    tpu.vector_store %arg4[%c0_14, %c0_15, %c0_16], %25 {strides = array<i32>} : memref<2x8x128xf32, #tpu.memory_space<vmem>>, vector<2x8x128xf32>,
    %27 = vector.broadcast %24 : vector<1x8x128xf32> to vector<2x8x128xf32>
    %28 = arith.mulf %21, %27 : vector<2x8x128xf32>
    %c0_17 = arith.constant 0 : index
    %c0_18 = arith.constant 0 : index
    %c0_19 = arith.constant 0 : index
    %29 = vector.load %arg5[%c0_17, %c0_18, %c0_19] : memref<2x8x128xf32, #tpu.memory_space<vmem>>, vector<2x8x128xf32>
    tpu.vector_store %arg5[%c0_17, %c0_18, %c0_19], %28 {strides = array<i32>} : memref<2x8x128xf32, #tpu.memory_space<vmem>>, vector<2x8x128xf32>,
    %cst_20 = arith.constant dense<0.000000e+00> : vector<8x128xf32>
    %30 = vector.multi_reduction <add>, %18, %cst_20 [0] : vector<2x8x128xf32> to vector<8x128xf32>
    %31 = vector.shape_cast %24 : vector<1x8x128xf32> to vector<8x128xf32>
    %32 = arith.mulf %30, %31 : vector<8x128xf32>
    %c0_21 = arith.constant 0 : index
    %c0_22 = arith.constant 0 : index
    %33 = vector.load %arg6[%c0_21, %c0_22] : memref<8x128xf32, #tpu.memory_space<vmem>>, vector<8x128xf32>
    tpu.vector_store %arg6[%c0_21, %c0_22], %32 {strides = array<i32>} : memref<8x128xf32, #tpu.memory_space<vmem>>, vector<8x128xf32>,
    %cst_23 = arith.constant dense<0.000000e+00> : vector<8x128xf32>
    %34 = vector.multi_reduction <add>, %21, %cst_23 [0] : vector<2x8x128xf32> to vector<8x128xf32>
    %35 = vector.shape_cast %24 : vector<1x8x128xf32> to vector<8x128xf32>
    %36 = arith.mulf %34, %35 : vector<8x128xf32>
    %c0_24 = arith.constant 0 : index
    %c0_25 = arith.constant 0 : index
    %37 = vector.load %arg7[%c0_24, %c0_25] : memref<8x128xf32, #tpu.memory_space<vmem>>, vector<8x128xf32>
    tpu.vector_store %arg7[%c0_24, %c0_25], %36 {strides = array<i32>} : memref<8x128xf32, #tpu.memory_space<vmem>>, vector<8x128xf32>,
    %38 = arith.mulf %17, %18 : vector<2x8x128xf32>
    %cst_26 = arith.constant dense<0.000000e+00> : vector<8x128xf32>
    %39 = vector.multi_reduction <add>, %38, %cst_26 [0] : vector<2x8x128xf32> to vector<8x128xf32>
    %40 = vector.shape_cast %24 : vector<1x8x128xf32> to vector<8x128xf32>
    %41 = arith.mulf %39, %40 : vector<8x128xf32>
    %c0_27 = arith.constant 0 : index
    %c0_28 = arith.constant 0 : index
    %42 = vector.load %arg8[%c0_27, %c0_28] : memref<8x128xf32, #tpu.memory_space<vmem>>, vector<8x128xf32>
    tpu.vector_store %arg8[%c0_27, %c0_28], %41 {strides = array<i32>} : memref<8x128xf32, #tpu.memory_space<vmem>>, vector<8x128xf32>,
    return
  }
  func.func @transform_0(%arg0: i32) -> (i32, i32, i32) {
    %c0_i32 = arith.constant 0 : i32
    %c0_i32_0 = arith.constant 0 : i32
    %c0_i32_1 = arith.constant 0 : i32
    return %c0_i32, %arg0, %c0_i32_0 : i32, i32, i32
  }
  func.func @transform_1(%arg0: i32) -> (i32, i32, i32) {
    %c0_i32 = arith.constant 0 : i32
    %c0_i32_0 = arith.constant 0 : i32
    %c0_i32_1 = arith.constant 0 : i32
    return %c0_i32, %arg0, %c0_i32_0 : i32, i32, i32
  }
  func.func @transform_2(%arg0: i32) -> (i32, i32, i32) {
    %c0_i32 = arith.constant 0 : i32
    %c0_i32_0 = arith.constant 0 : i32
    %c0_i32_1 = arith.constant 0 : i32
    return %c0_i32, %arg0, %c0_i32_0 : i32, i32, i32
  }
  func.func @transform_3(%arg0: i32) -> (i32, i32, i32) {
    %c0_i32 = arith.constant 0 : i32
    %c0_i32_0 = arith.constant 0 : i32
    %c0_i32_1 = arith.constant 0 : i32
    return %c0_i32, %arg0, %c0_i32_0 : i32, i32, i32
  }
  func.func @transform_4(%arg0: i32) -> (i32, i32, i32) {
    %c0_i32 = arith.constant 0 : i32
    %c0_i32_0 = arith.constant 0 : i32
    %c0_i32_1 = arith.constant 0 : i32
    return %c0_i32, %arg0, %c0_i32_0 : i32, i32, i32
  }
  func.func @transform_5(%arg0: i32) -> (i32, i32) {
    %c0_i32 = arith.constant 0 : i32
    %c0_i32_0 = arith.constant 0 : i32
    return %arg0, %c0_i32 : i32, i32
  }
  func.func @transform_6(%arg0: i32) -> (i32, i32) {
    %c0_i32 = arith.constant 0 : i32
    %c0_i32_0 = arith.constant 0 : i32
    return %arg0, %c0_i32 : i32, i32
  }
  func.func @transform_7(%arg0: i32) -> (i32, i32) {
    %c0_i32 = arith.constant 0 : i32
    %c0_i32_0 = arith.constant 0 : i32
    return %arg0, %c0_i32 : i32, i32
  }
}

</mosaic_0001>

<bundles_post_ra>
// kernel: tpu_custom_call.1
= control target key start
LH: loop header
LB: loop body
LE: loop exit
PB: predicated region body
PF: predicated region fallthrough
CT: control target
= control target key end

     0   :  { %13 = vsyncpa [#allocation3], 0  ;;  %s513_s0 = inlined_call_operand.hbm [shape: f32[2,8,128], index: 0, kind: input, shape index: {}]   ;;  %s514_s1 = inlined_call_operand.hbm [shape: f32[2,8,128], index: 1, kind: input, shape index: {}]   ;;  %s515_s2 = inlined_call_operand.hbm [shape: f32[2,8,128], index: 2, kind: input, shape index: {}]   ;;  %s516_s3 = inlined_call_operand.hbm [shape: f32[2,8,128], index: 3, kind: output, shape index: {0}]   ;;  %s517_s4 = inlined_call_operand.hbm [shape: f32[2,8,128], index: 4, kind: output, shape index: {1}]   ;;  %s518_s5 = inlined_call_operand.hbm [shape: f32[8,128], index: 5, kind: output, shape index: {2}]   ;;  %s519_s6 = inlined_call_operand.hbm [shape: f32[8,128], index: 6, kind: output, shape index: {3}]   ;;  %s520_s7 = inlined_call_operand.hbm [shape: f32[8,128], index: 7, kind: output, shape index: {4}]  }
   0x1   :  { %14 = vsyncpa [#allocation6], 0 }
   0x2   :  { %15 = vsyncpa [#allocation4], 0 }
   0x3   :  { %16 = vsyncpa [#allocation10], 0 }
   0x4   :  { %17 = vsyncpa [#allocation13], 0  ;;  %s381_s24 = smov [#allocation5]   ;;  %s382_s26 = smov [#allocation2]  }
   0x5   :  { %s35_s25 = sshll.u32 %s381_s24, 4  ;;  %s23_s27 = sshll.u32 %s382_s26, 4  ;;  %s36_s25 = int_to_ptr.vmem [resolvable:$true] %s35_s25  ;;  %s24_s27 = int_to_ptr.vmem [resolvable:$true] %s23_s27 }
   0x6   :  { %s219_s28 = scalar_lea.vmem %s36_s25, 256  ;;  %p224_p1 = scmp.lt.s32.totalorder %s36_s25, %s36_s25 }
   0x7   :  { %p220_p0 = scmp.ne.s32.totalorder %s36_s25, %s219_s28  ;;  %p225_p2 = scmp.lt.s32.totalorder %s219_s28, %s219_s28 }
   0x9   :  { %p226_p3 = por %p225_p2, %p224_p1 }
   0xb   :  { %p227_p4 = pnand %p226_p3, %p220_p0 }
   0xd   :  { %230 = shalt.err (!%p227_p4)
}
   0xe   :  { %s383_s29 = smov 128   ;;  %s384_s30 = smov 8  }
   0xf   :  { %41 = dma.hbm_to_vmem [thread:$0]  %s514_s1, 256, %s36_s25, [#allocation6], %s383_s29, %s383_s29, %s384_s30  }
  0x10   :  { %s239_s10 = scalar_lea.vmem %s24_s27, 256  ;;  %p244_p6 = scmp.lt.s32.totalorder %s24_s27, %s24_s27 }
  0x11   :  { %p240_p5 = scmp.ne.s32.totalorder %s24_s27, %s239_s10  ;;  %p245_p7 = scmp.lt.s32.totalorder %s239_s10, %s239_s10 }
  0x13   :  { %p246_p8 = por %p245_p7, %p244_p6 }
  0x15   :  { %p247_p9 = pnand %p246_p8, %p240_p5 }
  0x17   :  { %250 = shalt.err (!%p247_p9)
}
  0x18   :  { %29 = dma.hbm_to_vmem [thread:$0]  %s513_s0, 256, %s24_s27, [#allocation3], %s383_s29, %s383_s29, %s384_s30  }
  0x19   :  { %s385_s13 = smov [#allocation7]  }
  0x1a   :  { %s47_s14 = sshll.u32 %s385_s13, 4  ;;  %s48_s14 = int_to_ptr.vmem [resolvable:$true] %s47_s14 }
  0x1b   :  { %s259_s15 = scalar_lea.vmem %s48_s14, 256  ;;  %p264_p11 = scmp.lt.s32.totalorder %s48_s14, %s48_s14 }
  0x1c   :  { %p260_p10 = scmp.ne.s32.totalorder %s48_s14, %s259_s15  ;;  %p265_p12 = scmp.lt.s32.totalorder %s259_s15, %s259_s15 }
  0x1e   :  { %p266_p13 = por %p265_p12, %p264_p11 }
  0x20   :  { %p267_p0 = pnand %p266_p13, %p260_p10 }
  0x22   :  { %270 = shalt.err (!%p267_p0)
}
  0x23   :  { %53 = dma.hbm_to_vmem [thread:$0]  %s515_s2, 256, %s48_s14, [#allocation6], %s383_s29, %s383_s29, %s384_s30  }
  0x24   :  { %371 = dma.done.wait [#allocation3], 256  }
  0x25   :  { %372 = vsyncadd [#allocation3], 4294967040 }
  0x26   :  { %373 = dma.done.wait [#allocation6], 512  }
  0x27   :  { %374 = vsyncadd [#allocation6], 4294966784  ;;  %v449_v0 = vld [vmem:[#allocation5] sm:$0xff]  ;;  %v67_v1 = vld [vmem:[#allocation7] sm:$0xff]  ;;  %s386_s0 = smov [#allocation9]   ;;  %s387_s17 = smov [#allocation11]  }
  0x28   :  { %v68_v2 = vld [vmem:[#allocation7 + $0x8] sm:$0xff]  ;;  %v85_v3 = vsub.f32 1.0, %v449_v0  ;;  %v97_v4 = vfloor.f32 %v67_v1  ;;  %v452_v6 = vld [vmem:[#allocation5 + $0x8] sm:$0xff]  ;;  %v63_v7 = vld [vmem:[#allocation2] sm:$0xff]  ;;  %v93_v9 = vfloor.f32 %v449_v0  ;;  %s136_s2 = sshll.u32 %s386_s0, 4  ;;  %s149_s18 = sshll.u32 %s387_s17, 4  ;;  %s137_s2 = int_to_ptr.vmem [resolvable:$true] %s136_s2  ;;  %s150_s18 = int_to_ptr.vmem [resolvable:$true] %s149_s18 }
  0x29   :  { %v98_v5 = vfloor.f32 %v68_v2  ;;  %v64_v8 = vld [vmem:[#allocation2 + $0x8] sm:$0xff]  ;;  %v86_v10 = vsub.f32 1.0, %v452_v6  ;;  %203 = vlog2.f32 %v63_v7  ;;  %v75_v11 = vsub.f32 1.0, %v63_v7  ;;  %s388_s19 = smov [#allocation12]   ;;  %s271_s21 = scalar_lea.vmem %s137_s2, 256 }
  0x2a   :  { %v76_v12 = vsub.f32 1.0, %v64_v8  ;;  %v458_v13 = vfloor.f32 %v85_v3  ;;  %205 = vlog2.f32 %v64_v8  ;;  %v94_v15 = vfloor.f32 %v452_v6  ;;  %s159_s20 = sshll.u32 %s388_s19, 4  ;;  %p272_p1 = scmp.ne.s32.totalorder %s137_s2, %s271_s21  ;;  %s160_s20 = int_to_ptr.vmem [resolvable:$true] %s159_s20 }
  0x2b   :  { %v460_v14 = vadd.f32 %v98_v5, %v97_v4  ;;  %v465_v16 = vfloor.f32 %v86_v10  ;;  %207 = vlog2.f32 %v75_v11  ;;  %p276_p2 = scmp.lt.s32.totalorder %s137_s2, %s137_s2  ;;  %p277_p3 = scmp.lt.s32.totalorder %s271_s21, %s271_s21 }
  0x2c   :  { %209 = vlog2.f32 %v76_v12  ;;  %v108_v18 = vadd.f32 %v94_v15, %v93_v9 }
  0x2d   :  { %v104_v17 = vmul.f32 %v460_v14, %v458_v13  ;;  %v105_v19 = vmul.f32 %v460_v14, %v465_v16  ;;  %v111_v20 = vadd.f32 %v465_v16, %v458_v13  ;;  %p278_p4 = por %p277_p3, %p276_p2 }
  0x2e   :  { %v109_v21 = vmul.f32 %v108_v18, %v460_v14 }
  0x2f   :  { %106 = vst [vmem:[#allocation9] sm:$0xff] %v104_v17  ;;  %107 = vst [vmem:[#allocation9 + $0x8] sm:$0xff] %v105_v19  ;;  %v112_v22 = vmul.f32 %v111_v20, %v460_v14  ;;  %p279_p5 = pnand %p278_p4, %p272_p1 }
  0x30   :  { %110 = vst [vmem:[#allocation11] sm:$0xff] %v109_v21 }
  0x31   :  { %282 = shalt.err (!%p279_p5)
}
  0x32   :  { %142 = dma.vmem_to_hbm [thread:$0]  %s137_s2, 256, %s517_s4, [#allocation10], %s383_s29, %s383_s29, %s384_s30   ;;  %113 = vst [vmem:[#allocation12] sm:$0xff] %v112_v22 }
  0x33   :  { %s291_s24 = scalar_lea.vmem %s150_s18, 128  ;;  %p296_p7 = scmp.lt.s32.totalorder %s150_s18, %s150_s18 }
  0x34   :  { %p292_p6 = scmp.ne.s32.totalorder %s150_s18, %s291_s24  ;;  %p297_p8 = scmp.lt.s32.totalorder %s291_s24, %s291_s24 }
  0x36   :  { %p298_p9 = por %p297_p8, %p296_p7 }
  0x38   :  { %p299_p10 = pnand %p298_p9, %p292_p6 }
  0x3a   :  { %302 = shalt.err (!%p299_p10)
}
  0x3b   :  { %152 = dma.vmem_to_hbm [thread:$0]  %s150_s18, 128, %s518_s5, [#allocation10]  }
  0x3c   :  { %s311_s27 = scalar_lea.vmem %s160_s20, 128  ;;  %p316_p12 = scmp.lt.s32.totalorder %s160_s20, %s160_s20 }
  0x3d   :  { %p312_p11 = scmp.ne.s32.totalorder %s160_s20, %s311_s27  ;;  %p317_p13 = scmp.lt.s32.totalorder %s311_s27, %s311_s27 }
  0x3f   :  { %p318_p0 = por %p317_p13, %p316_p12 }
  0x41   :  { %p319_p1 = pnand %p318_p0, %p312_p11 }
  0x43   :  { %322 = shalt.err (!%p319_p1)
}
  0x44   :  { %162 = dma.vmem_to_hbm [thread:$0]  %s160_s20, 128, %s519_s6, [#allocation13]   ;;  %v204_v23 = vpop.eup %203 }
  0x45   :  { %v206_v24 = vpop.eup %205  ;;  %v70_v25 = vmul.f32 0.6931472, %v204_v23  ;;  %s389_s5 = smov [#allocation8]   ;;  %s390_s8 = smov [#allocation14]  }
  0x46   :  { %v208_v26 = vpop.eup %207  ;;  %v72_v27 = vmul.f32 0.6931472, %v206_v24  ;;  %s124_s6 = sshll.u32 %s389_s5, 4  ;;  %s169_s9 = sshll.u32 %s390_s8, 4  ;;  %s125_s6 = int_to_ptr.vmem [resolvable:$true] %s124_s6  ;;  %s170_s9 = int_to_ptr.vmem [resolvable:$true] %s169_s9 }
  0x47   :  { %v210_v28 = vpop.eup %209  ;;  %v73_v29 = vmax.f32 %v70_v25, -100.0  ;;  %v78_v30 = vmul.f32 0.6931472, %v208_v26  ;;  %s331_s10 = scalar_lea.vmem %s125_s6, 256  ;;  %p336_p3 = scmp.lt.s32.totalorder %s125_s6, %s125_s6 }
  0x48   :  { %v74_v31 = vmax.f32 %v72_v27, -100.0  ;;  %v80_v32 = vmul.f32 0.6931472, %v210_v28  ;;  %p332_p2 = scmp.ne.s32.totalorder %s125_s6, %s331_s10  ;;  %p337_p4 = scmp.lt.s32.totalorder %s331_s10, %s331_s10 }
  0x49   :  { %v81_v33 = vmax.f32 %v78_v30, -100.0  ;;  %v83_v34 = vmul.f32 %v73_v29, %v449_v0 }
  0x4a   :  { %v82_v35 = vmax.f32 %v80_v32, -100.0  ;;  %v84_v36 = vmul.f32 %v74_v31, %v452_v6  ;;  %p338_p5 = por %p337_p4, %p336_p3 }
  0x4b   :  { %v87_v37 = vmul.f32 %v85_v3, %v81_v33 }
  0x4c   :  { %v88_v38 = vmul.f32 %v86_v10, %v82_v35  ;;  %p339_p6 = pnand %p338_p5, %p332_p2 }
  0x4d   :  { %v89_v39 = vadd.f32 %v87_v37, %v83_v34 }
  0x4e   :  { %v90_v40 = vadd.f32 %v88_v38, %v84_v36 }
  0x4f   :  { %v91_v41 = vsub.f32 0.0, %v89_v39 }
  0x50   :  { %v92_v42 = vsub.f32 0.0, %v90_v40 }
  0x51   :  { %v100_v43 = vmul.f32 %v458_v13, %v91_v41  ;;  %v114_v44 = vmul.f32 %v93_v9, %v91_v41 }
  0x52   :  { %v101_v45 = vmul.f32 %v465_v16, %v92_v42  ;;  %v115_v46 = vmul.f32 %v94_v15, %v92_v42 }
  0x53   :  { %102 = vst [vmem:[#allocation8] sm:$0xff] %v100_v43 }
  0x54   :  { %103 = vst [vmem:[#allocation8 + $0x8] sm:$0xff] %v101_v45  ;;  %v116_v47 = vadd.f32 %v115_v46, %v114_v44 }
  0x55   :  { %342 = shalt.err (!%p339_p6)
}
  0x56   :  { %130 = dma.vmem_to_hbm [thread:$0]  %s125_s6, 256, %s516_s3, [#allocation4], %s383_s29, %s383_s29, %s384_s30   ;;  %v117_v48 = vmul.f32 %v116_v47, %v460_v14 }
  0x57   :  { %s351_s13 = scalar_lea.vmem %s170_s9, 128  ;;  %p356_p8 = scmp.lt.s32.totalorder %s170_s9, %s170_s9 }
  0x58   :  { %118 = vst [vmem:[#allocation14] sm:$0xff] %v117_v48  ;;  %p352_p7 = scmp.ne.s32.totalorder %s170_s9, %s351_s13  ;;  %p357_p9 = scmp.lt.s32.totalorder %s351_s13, %s351_s13 }
  0x5a   :  { %p358_p10 = por %p357_p9, %p356_p8 }
  0x5c   :  { %p359_p11 = pnand %p358_p10, %p352_p7 }
  0x5e   :  { %362 = shalt.err (!%p359_p11)
}
  0x5f   :  { %172 = dma.vmem_to_hbm [thread:$0]  %s170_s9, 128, %s520_s7, [#allocation13]  }
  0x60   :  { %375 = dma.done.wait [#allocation4], 256  }
  0x61   :  { %376 = vsyncadd [#allocation4], 4294967040 }
  0x62   :  { %377 = dma.done.wait [#allocation10], 384  }
  0x63   :  { %378 = vsyncadd [#allocation10], 4294966912 }
  0x64   :  { %379 = dma.done.wait [#allocation13], 256  }
  0x65   :  { %380 = vsyncadd [#allocation13], 4294967040 }
  0x66   :  { %188 = vsyncpa [#allocation3], 1 }
  0x67   :  { %189 = vsyncpa [#allocation6], 1 }
  0x68   :  { %190 = vsyncpa [#allocation4], 1 }
  0x69   :  { %191 = vsyncpa [#allocation10], 1 }
  0x6a   :  { %192 = vsyncpa [#allocation13], 1 }

</bundles_post_ra>
